<compile_context>
chip_gen: v6e
topology: v6e:2x2x1
jax: 0.10.0
libtpu: 0.0.40
codegen_flags: <defaults>
</compile_context>

<pallas_src>
import functools

import jax
import jax.numpy as jnp
from jax.experimental import pallas as pl
from jax.experimental.pallas import tpu as pltpu

LANE = 128
ROW_TILE_MAX = 1024   # (1024,128) f32 = 512 KiB per buffer; ~3 MiB total VMEM w/ scratch
N_CORE_SPLIT = 2      # leading "parallel" axis -> both TCs on v7x, no-op cost on v5e/v6e


def _loss_kernel(pred_ref, targ_ref, out_ref, acc_sq_ref, acc_abs_ref, *,
                 tiles_per_core, row_tile, total_rows, needs_mask):
    c = pl.program_id(0)   # core-split axis ("parallel")
    i = pl.program_id(1)   # reduction over row tiles ("arbitrary", last)

    @pl.when(i == 0)
    def _init():
        acc_sq_ref[...] = jnp.zeros_like(acc_sq_ref)
        acc_abs_ref[...] = jnp.zeros_like(acc_abs_ref)

    diff = pred_ref[...].astype(jnp.float32) - targ_ref[...].astype(jnp.float32)
    if needs_mask:
        # Zero contributions from logical rows past the end of the slab
        # (covers both the partial last tile and clamped/duplicated tiles).
        tile_idx = c * tiles_per_core + i            # logical (unclamped) tile
        row_ids = jax.lax.broadcasted_iota(jnp.int32, (row_tile, LANE), 0)
        valid = (tile_idx * row_tile + row_ids) < total_rows
        diff = jnp.where(valid, diff, 0.0)

    # Loop-carried dep is a cheap VPU add; hides under the input DMA.
    acc_sq_ref[...] += diff * diff
    acc_abs_ref[...] += jnp.abs(diff)

    @pl.when(i == pl.num_programs(1) - 1)
    def _finalize():
        # Single cross-lane/sublane reduce per core.
        out_ref[0, 0] = jnp.sum(acc_sq_ref[...])
        out_ref[0, 1] = jnp.sum(acc_abs_ref[...])


def custom_loss(predictions, targets, weight_mse=0.7, weight_mae=0.3):
    assert predictions.shape == targets.shape
    n_elems = predictions.size

    # Flatten in native dtype (no upcast -> no extra HBM traffic for bf16 etc.).
    pred_flat = jnp.ravel(predictions)
    targ_flat = jnp.ravel(targets)

    # Minimal lane padding: copies only when n_elems is not 128-aligned.
    rows = pl.cdiv(n_elems, LANE)
    padded = rows * LANE
    if padded != n_elems:
        # Both padded identically with zeros -> padded diffs are exactly 0.
        pred_flat = jnp.pad(pred_flat, (0, padded - n_elems))
        targ_flat = jnp.pad(targ_flat, (0, padded - n_elems))
    pred2d = pred_flat.reshape(rows, LANE)
    targ2d = targ_flat.reshape(rows, LANE)

    row_tile = rows if rows <= ROW_TILE_MAX else ROW_TILE_MAX
    num_tiles = pl.cdiv(rows, row_tile)
    n_cores = N_CORE_SPLIT if num_tiles >= N_CORE_SPLIT else 1
    tiles_per_core = pl.cdiv(num_tiles, n_cores)
    needs_mask = (n_cores * tiles_per_core * row_tile) > rows

    def in_map(c, i):
        t = c * tiles_per_core + i
        # Clamp so every DMA is in-bounds; duplicated tiles are masked to 0 in-kernel.
        return (jnp.minimum(t, num_tiles - 1), 0)

    kernel = functools.partial(
        _loss_kernel,
        tiles_per_core=tiles_per_core,
        row_tile=row_tile,
        total_rows=rows,
        needs_mask=needs_mask,
    )

    itemsize = jnp.dtype(predictions.dtype).itemsize
    cost = pl.CostEstimate(
        flops=5 * n_elems,
        transcendentals=0,
        bytes_accessed=2 * padded * itemsize + 8 * n_cores,
    )

    partials = pl.pallas_call(
        kernel,
        out_shape=jax.ShapeDtypeStruct((n_cores, 2), jnp.float32),
        grid_spec=pltpu.PrefetchScalarGridSpec(
            num_scalar_prefetch=0,
            grid=(n_cores, tiles_per_core),
            in_specs=[
                pl.BlockSpec((row_tile, LANE), in_map),
                pl.BlockSpec((row_tile, LANE), in_map),
            ],
            out_specs=pl.BlockSpec((1, 2), lambda c, i: (c, 0),
                                   memory_space=pltpu.SMEM),
            scratch_shapes=[
                pltpu.VMEM((row_tile, LANE), jnp.float32),
                pltpu.VMEM((row_tile, LANE), jnp.float32),
            ],
        ),
        compiler_params=pltpu.CompilerParams(
            dimension_semantics=("parallel", "arbitrary"),
        ),
        cost_estimate=cost,
    )(pred2d, targ2d)

    # Combine per-core partials and apply weights (padded diffs contribute 0,
    # so dividing by the true element count gives the exact mean).
    inv_n = 1.0 / float(n_elems)
    sse = jnp.sum(partials[:, 0])
    sae = jnp.sum(partials[:, 1])
    return weight_mse * (sse * inv_n) + weight_mae * (sae * inv_n)


def custom_loss_ref(predictions, targets, weight_mse=0.7, weight_mae=0.3):
    diff = predictions.astype(jnp.float32) - targets.astype(jnp.float32)
    return weight_mse * jnp.mean(diff * diff) + weight_mae * jnp.mean(jnp.abs(diff))


if __name__ == "__main__":
    key = jax.random.PRNGKey(0)
    k1, k2, k3, k4 = jax.random.split(key, 4)

    # Small NCHW-like regression outputs, consistent with the module's usage.
    pred = jax.random.normal(k1, (2, 4, 16, 16), dtype=jnp.float32)
    targ = jax.random.normal(k2, (2, 4, 16, 16), dtype=jnp.float32)
    loss = jax.block_until_ready(custom_loss(pred, targ))
    ref = jax.block_until_ready(custom_loss_ref(pred, targ))
    assert jnp.allclose(loss, ref, rtol=1e-5, atol=1e-6), (loss, ref)

    # bf16 inputs stay bf16 on the way into the kernel (halves HBM traffic);
    # the f32 upcast happens only inside the kernel.
    loss_bf = jax.block_until_ready(
        custom_loss(pred.astype(jnp.bfloat16), targ.astype(jnp.bfloat16)))
    ref_bf = jax.block_until_ready(
        custom_loss_ref(pred.astype(jnp.bfloat16), targ.astype(jnp.bfloat16)))
    assert jnp.allclose(loss_bf, ref_bf, rtol=1e-5, atol=1e-6), (loss_bf, ref_bf)

    # Ragged case: multiple row tiles, partial last tile, core-split clamp/mask path.
    pred_r = jax.random.normal(k3, (3000, 128), dtype=jnp.float32)
    targ_r = jax.random.normal(k4, (3000, 128), dtype=jnp.float32)
    loss_r = jax.block_until_ready(custom_loss(pred_r, targ_r))
    ref_r = jax.block_until_ready(custom_loss_ref(pred_r, targ_r))
    assert jnp.allclose(loss_r, ref_r, rtol=1e-4, atol=1e-5), (loss_r, ref_r)

    print("KERNEL_OK")
</pallas_src>

<mosaic_0001>
module attributes {stable_mosaic.version = 11 : i64} {
  func.func @_loss_kernel(%arg0: i32, %arg1: i32, %arg2: memref<16x128xf32, #tpu.memory_space<vmem>>, %arg3: memref<16x128xf32, #tpu.memory_space<vmem>>, %arg4: memref<1x2xf32, #tpu.memory_space<smem>>, %arg5: memref<16x128xf32, #tpu.memory_space<vmem>>, %arg6: memref<16x128xf32, #tpu.memory_space<vmem>>) attributes {dimension_semantics = [#tpu.dimension_semantics<parallel>, #tpu.dimension_semantics<arbitrary>], iteration_bounds = array<i64: 1, 1>, scalar_prefetch = 0 : i64, scratch_operands = 2 : i64, tpu.core_type = #tpu.core_type<tc>, window_params = [{transform_indices = @transform_0, window_bounds = array<i64: 16, 128>}, {transform_indices = @transform_1, window_bounds = array<i64: 16, 128>}, {transform_indices = @transform_2, window_bounds = array<i64: 1, 2>}]} {
    %c0_i32 = arith.constant 0 : i32
    %0 = arith.cmpi eq, %arg1, %c0_i32 : i32
    %1 = arith.extui %0 : i1 to i32
    %c0_i32_0 = arith.constant 0 : i32
    %2 = arith.cmpi ne, %1, %c0_i32_0 : i32
    scf.if %2 {
      %cst = arith.constant 0.000000e+00 : f32
      %17 = vector.broadcast %cst : f32 to vector<16x128xf32>
      %c0_14 = arith.constant 0 : index
      %c0_15 = arith.constant 0 : index
      %18 = vector.load %arg5[%c0_14, %c0_15] : memref<16x128xf32, #tpu.memory_space<vmem>>, vector<16x128xf32>
      tpu.vector_store %arg5[%c0_14, %c0_15], %17 {strides = array<i32>} : memref<16x128xf32, #tpu.memory_space<vmem>>, vector<16x128xf32>,
      %cst_16 = arith.constant 0.000000e+00 : f32
      %19 = vector.broadcast %cst_16 : f32 to vector<16x128xf32>
      %c0_17 = arith.constant 0 : index
      %c0_18 = arith.constant 0 : index
      %20 = vector.load %arg6[%c0_17, %c0_18] : memref<16x128xf32, #tpu.memory_space<vmem>>, vector<16x128xf32>
      tpu.vector_store %arg6[%c0_17, %c0_18], %19 {strides = array<i32>} : memref<16x128xf32, #tpu.memory_space<vmem>>, vector<16x128xf32>,
    } else {
    }
    %c0 = arith.constant 0 : index
    %c0_1 = arith.constant 0 : index
    %3 = vector.load %arg2[%c0, %c0_1] : memref<16x128xf32, #tpu.memory_space<vmem>>, vector<16x128xf32>
    %c0_2 = arith.constant 0 : index
    %c0_3 = arith.constant 0 : index
    %4 = vector.load %arg3[%c0_2, %c0_3] : memref<16x128xf32, #tpu.memory_space<vmem>>, vector<16x128xf32>
    %5 = arith.subf %3, %4 : vector<16x128xf32>
    %c0_4 = arith.constant 0 : index
    %c0_5 = arith.constant 0 : index
    %6 = vector.load %arg5[%c0_4, %c0_5] : memref<16x128xf32, #tpu.memory_space<vmem>>, vector<16x128xf32>
    %7 = arith.mulf %5, %5 : vector<16x128xf32>
    %8 = arith.addf %6, %7 : vector<16x128xf32>
    %c0_6 = arith.constant 0 : index
    %c0_7 = arith.constant 0 : index
    %9 = vector.load %arg5[%c0_6, %c0_7] : memref<16x128xf32, #tpu.memory_space<vmem>>, vector<16x128xf32>
    tpu.vector_store %arg5[%c0_6, %c0_7], %8 {strides = array<i32>} : memref<16x128xf32, #tpu.memory_space<vmem>>, vector<16x128xf32>,
    %c0_8 = arith.constant 0 : index
    %c0_9 = arith.constant 0 : index
    %10 = vector.load %arg6[%c0_8, %c0_9] : memref<16x128xf32, #tpu.memory_space<vmem>>, vector<16x128xf32>
    %11 = math.absf %5 : vector<16x128xf32>
    %12 = arith.addf %10, %11 : vector<16x128xf32>
    %c0_10 = arith.constant 0 : index
    %c0_11 = arith.constant 0 : index
    %13 = vector.load %arg6[%c0_10, %c0_11] : memref<16x128xf32, #tpu.memory_space<vmem>>, vector<16x128xf32>
    tpu.vector_store %arg6[%c0_10, %c0_11], %12 {strides = array<i32>} : memref<16x128xf32, #tpu.memory_space<vmem>>, vector<16x128xf32>,
    %c0_i32_12 = arith.constant 0 : i32
    %14 = arith.cmpi eq, %arg1, %c0_i32_12 : i32
    %15 = arith.extui %14 : i1 to i32
    %c0_i32_13 = arith.constant 0 : i32
    %16 = arith.cmpi ne, %15, %c0_i32_13 : i32
    scf.if %16 {
      %c0_14 = arith.constant 0 : index
      %c0_15 = arith.constant 0 : index
      %17 = vector.load %arg5[%c0_14, %c0_15] : memref<16x128xf32, #tpu.memory_space<vmem>>, vector<16x128xf32>
      %18 = vector.shape_cast %17 : vector<16x128xf32> to vector<1x16x128xf32>
      %cst = arith.constant dense<0.000000e+00> : vector<1xf32>
      %19 = vector.multi_reduction <add>, %18, %cst [1, 2] : vector<1x16x128xf32> to vector<1xf32>
      %20 = vector.shape_cast %19 : vector<1xf32> to vector<1x1x1xf32>
      %21 = vector.extract %20[0, 0, 0] : f32 from vector<1x1x1xf32>
      %c0_16 = arith.constant 0 : index
      %c0_17 = arith.constant 0 : index
      %22 = memref.load %arg4[%c0_16, %c0_17] : memref<1x2xf32, #tpu.memory_space<smem>>
      memref.store %21, %arg4[%c0_16, %c0_17] : memref<1x2xf32, #tpu.memory_space<smem>>
      %c0_18 = arith.constant 0 : index
      %c0_19 = arith.constant 0 : index
      %23 = vector.load %arg6[%c0_18, %c0_19] : memref<16x128xf32, #tpu.memory_space<vmem>>, vector<16x128xf32>
      %24 = vector.shape_cast %23 : vector<16x128xf32> to vector<1x16x128xf32>
      %cst_20 = arith.constant dense<0.000000e+00> : vector<1xf32>
      %25 = vector.multi_reduction <add>, %24, %cst_20 [1, 2] : vector<1x16x128xf32> to vector<1xf32>
      %26 = vector.shape_cast %25 : vector<1xf32> to vector<1x1x1xf32>
      %27 = vector.extract %26[0, 0, 0] : f32 from vector<1x1x1xf32>
      %c0_21 = arith.constant 0 : index
      %c1 = arith.constant 1 : index
      %28 = memref.load %arg4[%c0_21, %c1] : memref<1x2xf32, #tpu.memory_space<smem>>
      memref.store %27, %arg4[%c0_21, %c1] : memref<1x2xf32, #tpu.memory_space<smem>>
    } else {
    }
    return
  }
  func.func @transform_0(%arg0: i32, %arg1: i32) -> (i32, i32) {
    %c1_i32 = arith.constant 1 : i32
    %0 = arith.muli %arg0, %c1_i32 : i32
    %1 = arith.addi %0, %arg1 : i32
    %c0_i32 = arith.constant 0 : i32
    %2 = arith.minsi %1, %c0_i32 : i32
    %c0_i32_0 = arith.constant 0 : i32
    %c0_i32_1 = arith.constant 0 : i32
    return %2, %c0_i32_0 : i32, i32
  }
  func.func @transform_1(%arg0: i32, %arg1: i32) -> (i32, i32) {
    %c1_i32 = arith.constant 1 : i32
    %0 = arith.muli %arg0, %c1_i32 : i32
    %1 = arith.addi %0, %arg1 : i32
    %c0_i32 = arith.constant 0 : i32
    %2 = arith.minsi %1, %c0_i32 : i32
    %c0_i32_0 = arith.constant 0 : i32
    %c0_i32_1 = arith.constant 0 : i32
    return %2, %c0_i32_0 : i32, i32
  }
  func.func @transform_2(%arg0: i32, %arg1: i32) -> (i32, i32) {
    %c0_i32 = arith.constant 0 : i32
    %c0_i32_0 = arith.constant 0 : i32
    return %arg0, %c0_i32 : i32, i32
  }
}

</mosaic_0001>

<bundles_post_ra>
// kernel: tpu_custom_call.1
= control target key start
LH: loop header
LB: loop body
LE: loop exit
PB: predicated region body
PF: predicated region fallthrough
CT: control target
= control target key end

     0   :  { %7 = vsyncpa [#allocation5], 0  ;;  %s232_s0 = inlined_call_operand.hbm [shape: f32[16,128], index: 0, kind: input, shape index: {}]   ;;  %s233_s1 = inlined_call_operand.hbm [shape: f32[16,128], index: 1, kind: input, shape index: {}]   ;;  %s234_s2 = inlined_call_operand.hbm [shape: f32[1,2], index: 2, kind: output, shape index: {}]  }
   0x1   :  { %8 = vsyncpa [#allocation8], 0 }
   0x2   :  { %9 = vsyncpa [#allocation6], 0  ;;  %s203_s9 = smov [#allocation4]  }
   0x3   :  { %s21_s10 = sshll.u32 %s203_s9, 4  ;;  %s22_s10 = int_to_ptr.vmem [resolvable:$true] %s21_s10 }
   0x4   :  { %s157_s11 = scalar_lea.vmem %s22_s10, 256  ;;  %p162_p1 = scmp.lt.s32.totalorder %s22_s10, %s22_s10 }
   0x5   :  { %p158_p0 = scmp.ne.s32.totalorder %s22_s10, %s157_s11  ;;  %p163_p2 = scmp.lt.s32.totalorder %s157_s11, %s157_s11 }
   0x7   :  { %p164_p3 = por %p163_p2, %p162_p1 }
   0x9   :  { %p165_p4 = pnand %p164_p3, %p158_p0 }
   0xb   :  { %168 = shalt.err (!%p165_p4)
}
   0xc   :  { %s204_s12 = smov 128   ;;  %s205_s13 = smov 8  }
   0xd   :  { %27 = dma.hbm_to_vmem [thread:$0]  %s232_s0, 256, %s22_s10, [#allocation5], %s204_s12, %s204_s12, %s205_s13  }
   0xe   :  { %s206_s16 = smov [#allocation7]  }
   0xf   :  { %s39_s17 = sshll.u32 %s206_s16, 4  ;;  %s40_s17 = int_to_ptr.vmem [resolvable:$true] %s39_s17 }
  0x10   :  { %s177_s18 = scalar_lea.vmem %s40_s17, 256  ;;  %p182_p6 = scmp.lt.s32.totalorder %s40_s17, %s40_s17 }
  0x11   :  { %p178_p5 = scmp.ne.s32.totalorder %s40_s17, %s177_s18  ;;  %p183_p7 = scmp.lt.s32.totalorder %s177_s18, %s177_s18 }
  0x13   :  { %p184_p8 = por %p183_p7, %p182_p6 }
  0x15   :  { %p185_p9 = pnand %p184_p8, %p178_p5 }
  0x17   :  { %188 = shalt.err (!%p185_p9)
}
  0x18   :  { %45 = dma.hbm_to_vmem [thread:$0]  %s233_s1, 256, %s40_s17, [#allocation8], %s204_s12, %s204_s12, %s205_s13  }
  0x19   :  { %197 = dma.done.wait [#allocation5], 256  }
  0x1a   :  { %198 = vsyncadd [#allocation5], 4294967040 }
  0x1b   :  { %199 = dma.done.wait [#allocation8], 256  }
  0x1c   :  { %200 = vsyncadd [#allocation8], 4294967040  ;;  %v68_v0 = vld [vmem:[#allocation4] sm:$0xff]  ;;  %v69_v1 = vld [vmem:[#allocation4 + $0x8] sm:$0xff]  ;;  %s207_s21 = smov [#allocation9]  }
  0x1d   :  { %v70_v2 = vld [vmem:[#allocation7] sm:$0xff]  ;;  %v71_v3 = vld [vmem:[#allocation7 + $0x8] sm:$0xff] }
  0x1e   :  { %v72_v4 = vsub.f32 %v68_v0, %v70_v2  ;;  %v73_v5 = vsub.f32 %v69_v1, %v71_v3 }
  0x20   :  { %v76_v6 = vmul.f32 %v72_v4, %v72_v4  ;;  %v77_v7 = vmul.f32 %v73_v5, %v73_v5  ;;  %v84_v8 = vand.u32 2147483647, %v72_v4  ;;  %v85_v9 = vand.u32 2147483647, %v73_v5 }
  0x22   :  { %v95_v10 = vadd.f32 %v77_v7, %v76_v6  ;;  %v109_v11 = vadd.f32 %v85_v9, %v84_v8 }
  0x24   :  { %96 = vadd.xlane.f32.xlu0 %v95_v10 }
  0x28   :  { %110 = vadd.xlane.f32.xlu0 %v109_v11 }
  0xad   :  { %v97_v12 = vpop.xlane.xlu0 %96 }
  0xae   :  { %v98_v13 = vrot.slane %v97_v12, 4 }
  0xb0   :  { %v99_v14 = vadd.f32 %v98_v13, %v97_v12 }
  0xb1   :  { %v111_v15 = vpop.xlane.xlu0 %110 }
  0xb2   :  { %v100_v16 = vrot.slane %v99_v14, 2  ;;  %v112_v17 = vrot.slane %v111_v15, 4 }
  0xb4   :  { %v113_v18 = vadd.f32 %v112_v17, %v111_v15  ;;  %v101_v19 = vadd.f32 %v100_v16, %v99_v14 }
  0xb6   :  { %v114_v20 = vrot.slane %v113_v18, 2  ;;  %v102_v21 = vrot.slane %v101_v19, 1 }
  0xb8   :  { %v115_v22 = vadd.f32 %v114_v20, %v113_v18  ;;  %v103_v23 = vadd.f32 %v102_v21, %v101_v19 }
  0xba   :  { %140 = vpush %v103_v23  ;;  %v116_v24 = vrot.slane %v115_v22, 1 }
  0xbc   :  { %v117_v25 = vadd.f32 %v116_v24, %v115_v22 }
  0xbe   :  { %142 = vpush %v117_v25 }
  0xeb   :  { %s141_s0 = spop %140 }
  0xec   :  { %106 = sst [smem:[#allocation9]] %s141_s0 }
  0xef   :  { %s143_s1 = spop %142 }
  0xf0   :  { %120 = sst [smem:[#allocation9 + $0x1]] %s143_s1 }
  0xf1   :  { %128 = dma.smem_to_hbm %s207_s21, 16, %s234_s2, [#allocation6]  }
  0xf2   :  { %201 = dma.done.wait [#allocation6], 16  }
  0xf3   :  { %202 = vsyncadd [#allocation6], 4294967280 }
  0xf4   :  { %132 = sfence }
  0xf5   :  { %133 = vsyncpa [#allocation5], 1 }
  0xf6   :  { %134 = vsyncpa [#allocation8], 1 }
  0xf7   :  { %135 = vsyncpa [#allocation6], 1 }

</bundles_post_ra>
